<compile_context>
chip_gen: v5e
topology: v5e:2x2
jax: 0.10.0
libtpu: 0.0.40
codegen_flags: <defaults>
</compile_context>

<pallas_src>
import functools

import jax
import jax.numpy as jnp
from jax.experimental import pallas as pl
from jax.experimental.pallas import tpu as pltpu

SMOOTHING = 0.05
LANES = 128


def _cdiv(a, b):
    return (a + b - 1) // b


def _round_up(a, b):
    return _cdiv(a, b) * b


def _chip_defaults():
    """Return (target_tile_rows, ncores) per TPU generation."""
    try:
        kind = jax.devices()[0].device_kind.lower()
    except Exception:
        kind = ""
    if "v7" in kind:
        # 2 TensorCores / chip, fast HBM: big tiles + per-core partial sums.
        return 8192, 2
    if "v6" in kind:
        return 8192, 1
    # v5e and unknown chips: stay well inside the 16 MiB default scoped VMEM.
    return 4096, 1


def _bce_smooth_kernel(x_ref, t_ref, out_ref, *, smoothing, tile_rows,
                       tiles_per_core, rows_valid, mask_tail):
    c = pl.program_id(0)   # core / partial-sum slot
    i = pl.program_id(1)   # tile within this core's row range (reduction axis)

    @pl.when(i == 0)
    def _():
        out_ref[...] = jnp.zeros_like(out_ref)

    x = x_ref[...].astype(jnp.float32)      # (tile_rows, 128)
    t = t_ref[...].astype(jnp.float32)

    # label smoothing (in f32)
    st = t * (1.0 - smoothing) + 0.5 * smoothing

    # numerically-stable BCE with logits (same formulation as PyTorch)
    loss = jnp.maximum(x, 0.0) - x * st + jnp.log1p(jnp.exp(-jnp.abs(x)))

    if mask_tail:
        # Intended (unclamped) global row of each row in this block; rows beyond the
        # true extent (ragged last tile / clamped duplicate block) contribute zero.
        row0 = (c * tiles_per_core + i) * tile_rows
        local_row = jax.lax.broadcasted_iota(jnp.int32, loss.shape, 0)
        loss = jnp.where(row0 + local_row < rows_valid, loss, 0.0)

    # Lane/sublane-dense partial sum; only reduce the "vregs per tile" axis.
    # Output block index is constant across i -> stays VMEM-resident (accumulator).
    out_ref[...] += loss.reshape(-1, 8, LANES).sum(axis=0)[None]


def bce_with_logits_label_smoothing(inputs, targets, smoothing=SMOOTHING):
    """Mean-reduced BCEWithLogitsLoss over label-smoothed targets."""
    assert inputs.shape == targets.shape
    n = 1
    for d in inputs.shape:
        n *= int(d)
    smoothing = float(smoothing)

    x_flat = inputs.reshape(-1)
    t_flat = targets.reshape(-1)

    rows = n // LANES          # full 128-lane rows -> handled by the kernel
    rem = n - rows * LANES     # <128-element flat tail -> tiny plain-JAX epilogue

    total = jnp.float32(0.0)

    if rem:
        xt = x_flat[rows * LANES:].astype(jnp.float32)
        st = t_flat[rows * LANES:].astype(jnp.float32) * (1.0 - smoothing) + 0.5 * smoothing
        total = total + jnp.sum(jnp.maximum(xt, 0.0) - xt * st
                                + jnp.log1p(jnp.exp(-jnp.abs(xt))))

    if rows > 0:
        x2 = (x_flat if rem == 0 else x_flat[: rows * LANES]).reshape(rows, LANES)
        t2 = (t_flat if rem == 0 else t_flat[: rows * LANES]).reshape(rows, LANES)

        target_tile_rows, ncores = _chip_defaults()
        if rows <= target_tile_rows:
            # Small input: single block, single core.
            ncores = 1
            tile_rows = _round_up(max(rows, 8), 8)
        else:
            tile_rows = target_tile_rows

        ntiles_total = _cdiv(rows, tile_rows)
        if ncores > ntiles_total:
            ncores = 1
        tiles_per_core = _cdiv(ntiles_total, ncores)
        mask_tail = (tile_rows * ntiles_total != rows) or (ncores * tiles_per_core != ntiles_total)

        last_tile = ntiles_total - 1
        if ncores * tiles_per_core != ntiles_total:
            # Grid overshoots the tile count: clamp the block index (the kernel masks
            # the duplicate block to zero), so every DMA stays in bounds.
            def in_map(c, i):
                return (jnp.minimum(c * tiles_per_core + i, last_tile), 0)
        else:
            def in_map(c, i):
                return (c * tiles_per_core + i, 0)

        kernel = functools.partial(
            _bce_smooth_kernel, smoothing=smoothing, tile_rows=tile_rows,
            tiles_per_core=tiles_per_core, rows_valid=rows, mask_tail=mask_tail)

        # Scoped-VMEM budget: double-buffered input tiles + headroom (clamped to stay
        # well under v7x's 64 MiB physical VMEM).
        tile_bytes = tile_rows * LANES * (x2.dtype.itemsize + t2.dtype.itemsize)
        vmem_limit = int(min(max(2 * tile_bytes + (4 << 20), 32 << 20), 48 << 20))

        partial_sums = pl.pallas_call(
            kernel,
            out_shape=jax.ShapeDtypeStruct((ncores, 8, LANES), jnp.float32),
            grid_spec=pltpu.PrefetchScalarGridSpec(
                num_scalar_prefetch=0,
                grid=(ncores, tiles_per_core),
                in_specs=[
                    pl.BlockSpec((tile_rows, LANES), in_map),
                    pl.BlockSpec((tile_rows, LANES), in_map),
                ],
                out_specs=pl.BlockSpec((1, 8, LANES), lambda c, i: (c, 0, 0)),
            ),
            compiler_params=pltpu.CompilerParams(
                # TODO(synk): on v7x verify the leading axis really shards across both
                # TensorCores (xprof); if not, switch it to pltpu.CORE_PARALLEL.
                dimension_semantics=("parallel", "arbitrary"),
                vmem_limit_bytes=vmem_limit,
            ),
        )(x2, t2)

        total = total + jnp.sum(partial_sums)

    # TODO(synk): only reduction='mean' is implemented.
    return total / jnp.float32(n)


def _reference(x, t, smoothing=SMOOTHING):
    st = t * (1.0 - smoothing) + 0.5 * smoothing
    return jnp.mean(jnp.maximum(x, 0.0) - x * st + jnp.log1p(jnp.exp(-jnp.abs(x))))


if __name__ == "__main__":
    key = jax.random.PRNGKey(0)
    kx, kt, kx2, kt2 = jax.random.split(key, 4)

    # NCHW inputs, like the PyTorch call site: logits + {0,1} targets.
    x = jax.random.normal(kx, (2, 4, 16, 16), dtype=jnp.float32)
    t = (jax.random.uniform(kt, (2, 4, 16, 16)) > 0.5).astype(jnp.float32)

    loss = bce_with_logits_label_smoothing(x, t)
    jax.block_until_ready(loss)
    assert jnp.allclose(loss, _reference(x, t), atol=1e-5, rtol=1e-5)

    # Odd size: exercises the ragged-tile mask and the <128-element tail path.
    x_odd = jax.random.normal(kx2, (3, 5, 17, 19), dtype=jnp.float32)
    t_odd = (jax.random.uniform(kt2, (3, 5, 17, 19)) > 0.5).astype(jnp.float32)
    loss_odd = bce_with_logits_label_smoothing(x_odd, t_odd)
    jax.block_until_ready(loss_odd)
    assert jnp.allclose(loss_odd, _reference(x_odd, t_odd), atol=1e-5, rtol=1e-5)

    print("KERNEL_OK")
</pallas_src>

<mosaic_0001>
module attributes {stable_mosaic.version = 11 : i64} {
  func.func @_bce_smooth_kernel(%arg0: i32, %arg1: i32, %arg2: memref<16x128xf32, #tpu.memory_space<vmem>>, %arg3: memref<16x128xf32, #tpu.memory_space<vmem>>, %arg4: memref<1x8x128xf32, #tpu.memory_space<vmem>>) attributes {dimension_semantics = [#tpu.dimension_semantics<parallel>, #tpu.dimension_semantics<arbitrary>], iteration_bounds = array<i64: 1, 1>, scalar_prefetch = 0 : i64, scratch_operands = 0 : i64, tpu.core_type = #tpu.core_type<tc>, window_params = [{transform_indices = @transform_0, window_bounds = array<i64: 16, 128>}, {transform_indices = @transform_1, window_bounds = array<i64: 16, 128>}, {transform_indices = @transform_2, window_bounds = array<i64: 1, 8, 128>}]} {
    %c0_i32 = arith.constant 0 : i32
    %0 = arith.cmpi eq, %arg1, %c0_i32 : i32
    %1 = arith.extui %0 : i1 to i32
    %c0_i32_0 = arith.constant 0 : i32
    %2 = arith.cmpi ne, %1, %c0_i32_0 : i32
    scf.if %2 {
      %cst_14 = arith.constant 0.000000e+00 : f32
      %25 = vector.broadcast %cst_14 : f32 to vector<1x8x128xf32>
      %c0_15 = arith.constant 0 : index
      %c0_16 = arith.constant 0 : index
      %c0_17 = arith.constant 0 : index
      %26 = vector.load %arg4[%c0_15, %c0_16, %c0_17] : memref<1x8x128xf32, #tpu.memory_space<vmem>>, vector<1x8x128xf32>
      tpu.vector_store %arg4[%c0_15, %c0_16, %c0_17], %25 {strides = array<i32>} : memref<1x8x128xf32, #tpu.memory_space<vmem>>, vector<1x8x128xf32>,
    } else {
    }
    %c0 = arith.constant 0 : index
    %c0_1 = arith.constant 0 : index
    %3 = vector.load %arg2[%c0, %c0_1] : memref<16x128xf32, #tpu.memory_space<vmem>>, vector<16x128xf32>
    %c0_2 = arith.constant 0 : index
    %c0_3 = arith.constant 0 : index
    %4 = vector.load %arg3[%c0_2, %c0_3] : memref<16x128xf32, #tpu.memory_space<vmem>>, vector<16x128xf32>
    %cst = arith.constant 0.949999988 : f32
    %5 = vector.broadcast %cst : f32 to vector<16x128xf32>
    %6 = arith.mulf %4, %5 : vector<16x128xf32>
    %cst_4 = arith.constant 2.500000e-02 : f32
    %7 = vector.broadcast %cst_4 : f32 to vector<16x128xf32>
    %8 = arith.addf %6, %7 : vector<16x128xf32>
    %cst_5 = arith.constant 0.000000e+00 : f32
    %9 = vector.broadcast %cst_5 : f32 to vector<16x128xf32>
    %10 = arith.maximumf %3, %9 : vector<16x128xf32>
    %11 = arith.mulf %3, %8 : vector<16x128xf32>
    %12 = arith.subf %10, %11 : vector<16x128xf32>
    %13 = math.absf %3 : vector<16x128xf32>
    %cst_6 = arith.constant 0.000000e+00 : f32
    %14 = vector.broadcast %cst_6 : f32 to vector<16x128xf32>
    %15 = arith.subf %14, %13 : vector<16x128xf32>
    %16 = math.exp %15 : vector<16x128xf32>
    %17 = math.log1p %16 : vector<16x128xf32>
    %18 = arith.addf %12, %17 : vector<16x128xf32>
    %c0_7 = arith.constant 0 : index
    %c0_8 = arith.constant 0 : index
    %c0_9 = arith.constant 0 : index
    %19 = vector.load %arg4[%c0_7, %c0_8, %c0_9] : memref<1x8x128xf32, #tpu.memory_space<vmem>>, vector<1x8x128xf32>
    %20 = vector.shape_cast %18 : vector<16x128xf32> to vector<2x8x128xf32>
    %cst_10 = arith.constant dense<0.000000e+00> : vector<8x128xf32>
    %21 = vector.multi_reduction <add>, %20, %cst_10 [0] : vector<2x8x128xf32> to vector<8x128xf32>
    %22 = vector.shape_cast %21 : vector<8x128xf32> to vector<1x8x128xf32>
    %23 = arith.addf %19, %22 : vector<1x8x128xf32>
    %c0_11 = arith.constant 0 : index
    %c0_12 = arith.constant 0 : index
    %c0_13 = arith.constant 0 : index
    %24 = vector.load %arg4[%c0_11, %c0_12, %c0_13] : memref<1x8x128xf32, #tpu.memory_space<vmem>>, vector<1x8x128xf32>
    tpu.vector_store %arg4[%c0_11, %c0_12, %c0_13], %23 {strides = array<i32>} : memref<1x8x128xf32, #tpu.memory_space<vmem>>, vector<1x8x128xf32>,
    return
  }
  func.func @transform_0(%arg0: i32, %arg1: i32) -> (i32, i32) {
    %c1_i32 = arith.constant 1 : i32
    %0 = arith.muli %arg0, %c1_i32 : i32
    %1 = arith.addi %0, %arg1 : i32
    %c0_i32 = arith.constant 0 : i32
    %c0_i32_0 = arith.constant 0 : i32
    return %1, %c0_i32 : i32, i32
  }
  func.func @transform_1(%arg0: i32, %arg1: i32) -> (i32, i32) {
    %c1_i32 = arith.constant 1 : i32
    %0 = arith.muli %arg0, %c1_i32 : i32
    %1 = arith.addi %0, %arg1 : i32
    %c0_i32 = arith.constant 0 : i32
    %c0_i32_0 = arith.constant 0 : i32
    return %1, %c0_i32 : i32, i32
  }
  func.func @transform_2(%arg0: i32, %arg1: i32) -> (i32, i32, i32) {
    %c0_i32 = arith.constant 0 : i32
    %c0_i32_0 = arith.constant 0 : i32
    %c0_i32_1 = arith.constant 0 : i32
    return %arg0, %c0_i32, %c0_i32_0 : i32, i32, i32
  }
}

</mosaic_0001>

<bundles_post_ra>
// kernel: tpu_custom_call.1
= control target key start
LH: loop header
LB: loop body
LE: loop exit
PB: predicated region body
PF: predicated region fallthrough
CT: control target
= control target key end

     0   :  { %7 = vsyncpa [#allocation3], 0  ;;  %s246_s0 = inlined_call_operand.hbm [shape: f32[16,128], index: 0, kind: input, shape index: {}]   ;;  %s247_s1 = inlined_call_operand.hbm [shape: f32[16,128], index: 1, kind: input, shape index: {}]   ;;  %s248_s2 = inlined_call_operand.hbm [shape: f32[1,8,128], index: 2, kind: output, shape index: {}]  }
   0x1   :  { %8 = vsyncpa [#allocation6], 0 }
   0x2   :  { %9 = vsyncpa [#allocation4], 0  ;;  %s18_s11 = sshll.u32 %s246_s0, 4  ;;  %s217_s12 = smov [#allocation2]   ;;  %s19_s11 = int_to_ptr.hbm [resolvable:$true] %s18_s11 }
   0x3   :  { %s20_s13 = sshll.u32 %s217_s12, 4  ;;  %s35_s16 = sshll.u32 %s247_s1, 4  ;;  %s21_s13 = int_to_ptr.vmem [resolvable:$true] %s20_s13  ;;  %s36_s16 = int_to_ptr.hbm [resolvable:$true] %s35_s16 }
   0x4   :  { %s218_s17 = smov 128   ;;  %s219_s18 = smov 8  }
   0x5   :  { %26 = dma.hbm_to_vmem [thread:$0]  %s19_s11, 256, %s21_s13, [#allocation3], %s218_s17, %s218_s17, %s219_s18  }
   0x6   :  { %s220_s19 = smov [#allocation5]  }
   0x7   :  { %s37_s20 = sshll.u32 %s220_s19, 4  ;;  %s38_s20 = int_to_ptr.vmem [resolvable:$true] %s37_s20 }
   0x8   :  { %43 = dma.hbm_to_vmem [thread:$0]  %s36_s16, 256, %s38_s20, [#allocation6], %s218_s17, %s218_s17, %s219_s18  }
   0x9   :  { %211 = dma.done.wait [#allocation3], 256  }
   0xa   :  { %212 = vsyncadd [#allocation3], 4294967040 }
   0xb   :  { %213 = dma.done.wait [#allocation6], 256  }
   0xc   :  { %214 = vsyncadd [#allocation6], 4294967040  ;;  %v61_v0 = vld [vmem:[#allocation2] sm:$0xff]  ;;  %v62_v1 = vld [vmem:[#allocation2 + $0x8] sm:$0xff]  ;;  %s221_s0 = smov [#allocation7]   ;;  %s114_s23 = sshll.u32 %s248_s2, 4  ;;  %s115_s23 = int_to_ptr.hbm [resolvable:$true] %s114_s23 }
   0xd   :  { %v75_v2 = vand.u32 2147483647, %v61_v0  ;;  %v76_v3 = vand.u32 2147483647, %v62_v1  ;;  %v63_v8 = vld [vmem:[#allocation5] sm:$0xff]  ;;  %v64_v9 = vld [vmem:[#allocation5 + $0x8] sm:$0xff] }
   0xe   :  { %v65_v10 = vmul.f32 0.95, %v63_v8  ;;  %v66_v11 = vmul.f32 0.95, %v64_v9  ;;  %v69_v21 = vmax.f32 %v61_v0, 0.0  ;;  %v70_v25 = vmax.f32 %v62_v1, 0.0 }
   0xf   :  { %v77_v4 = vsub.f32 0.0, %v75_v2  ;;  %v78_v5 = vsub.f32 0.0, %v76_v3  ;;  %s112_s1 = sshll.u32 %s221_s0, 4  ;;  %s113_s1 = int_to_ptr.vmem [resolvable:$true] %s112_s1 }
  0x10   :  { %v67_v14 = vadd.f32 0.025, %v65_v10  ;;  %v68_v17 = vadd.f32 0.025, %v66_v11 }
  0x11   :  { %v79_v6 = vmul.f32 1.442695, %v77_v4  ;;  %v81_v7 = vmul.f32 1.442695, %v78_v5 }
  0x12   :  { %v71_v22 = vmul.f32 %v67_v14, %v61_v0  ;;  %v72_v26 = vmul.f32 %v68_v17, %v62_v1 }
  0x13   :  { %131 = vpow2.f32 %v79_v6 }
  0x14   :  { %133 = vpow2.f32 %v81_v7  ;;  %v73_v30 = vsub.f32 %v69_v21, %v71_v22  ;;  %v74_v33 = vsub.f32 %v70_v25, %v72_v26 }
  0x19   :  { %v132_v12 = vpop.eup %131 }
  0x1a   :  { %v134_v13 = vpop.eup %133  ;;  %v83_v15 = vadd.f32 1.0, %v132_v12  ;;  %v86_v16 = vmul.f32 -0.5, %v132_v12  ;;  %v89_v23 = vand.u32 2147483647, %v132_v12 }
  0x1b   :  { %v92_v18 = vadd.f32 1.0, %v134_v13  ;;  %v95_v19 = vmul.f32 -0.5, %v134_v13  ;;  %v98_v27 = vand.u32 2147483647, %v134_v13 }
  0x1c   :  { %135 = vlog2.f32 %v83_v15  ;;  %v87_v20 = vadd.f32 1.0, %v86_v16  ;;  %vm90_vm0 = vcmp.lt.f32.partialorder %v89_v23, 0.0004427343 }
  0x1d   :  { %137 = vlog2.f32 %v92_v18  ;;  %v96_v24 = vadd.f32 1.0, %v95_v19  ;;  %vm99_vm1 = vcmp.lt.f32.partialorder %v98_v27, 0.0004427343 }
  0x1e   :  { %v88_v28 = vmul.f32 %v132_v12, %v87_v20 }
  0x1f   :  { %v97_v31 = vmul.f32 %v134_v13, %v96_v24 }
  0x22   :  { %v136_v29 = vpop.eup %135 }
  0x23   :  { %v138_v32 = vpop.eup %137  ;;  %v85_v34 = vmul.f32 0.6931472, %v136_v29 }
  0x24   :  { %v94_v35 = vmul.f32 0.6931472, %v138_v32 }
  0x25   :  { %v91_v36 = vsel %vm90_vm0, %v88_v28, %v85_v34 }
  0x26   :  { %v100_v37 = vsel %vm99_vm1, %v97_v31, %v94_v35  ;;  %v101_v38 = vadd.f32 %v91_v36, %v73_v30 }
  0x27   :  { %v102_v39 = vadd.f32 %v100_v37, %v74_v33 }
  0x29   :  { %v104_v40 = vadd.f32 %v102_v39, %v101_v38 }
  0x2b   :  { %106 = vst [vmem:[#allocation7] sm:$0xff] %v104_v40 }
  0x2c   :  { %117 = dma.vmem_to_hbm [thread:$0]  %s113_s1, 128, %s115_s23, [#allocation4]  }
  0x2d   :  { %215 = dma.done.wait [#allocation4], 128  }
  0x2e   :  { %216 = vsyncadd [#allocation4], 4294967168 }
  0x2f   :  { %122 = vsyncpa [#allocation3], 1 }
  0x30   :  { %123 = vsyncpa [#allocation6], 1 }
  0x31   :  { %124 = vsyncpa [#allocation4], 1 }

</bundles_post_ra>
